<compile_context>
chip_gen: v7x
topology: tpu7x:2x2x1
jax: 0.10.0
libtpu: 0.0.40
codegen_flags: <defaults>
</compile_context>

<pallas_src>
import functools

import jax
import jax.numpy as jnp
from jax import lax
from jax.experimental import pallas as pl
from jax.experimental.pallas import tpu as pltpu

EPS = 1e-5  # nn.InstanceNorm2d default eps (affine=False, biased variance)


def _residual_block_kernel(x_ref, m_ref, w1_ref, w2_ref, o_ref, *, C, H, W, S_pad):
    """Fused [ReflPad+Conv3x3+IN] x2 + residual for one batch sample.

    x_ref:  (1, C, S_pad)  sample in flat zero-padded layout (Hp*Wp row-major,
                           lane-padded to S_pad); reflect borders fixed here.
    m_ref:  (8, S_pad)     f32 masks: row 0 interior, rows 1-4 L/R/T/B borders.
    w*_ref: (3, C, 3*C)    conv weights grouped by dh; columns are dw-major.
    o_ref:  (1, C, S_pad)  output sample, same padded layout.
    """
    Wp = W + 2
    inv_hw = 1.0 / float(H * W)

    def shift_read(a, d):
        # result[:, s] = a[:, (s + d) mod S_pad].  Circular wraparound never
        # reaches positions that are consumed for interior outputs (|d| <= Wp+1
        # while interior positions live in [Wp+1, S-Wp-2]).
        s = (-d) % S_pad
        return a if s == 0 else pltpu.roll(a, s, axis=1)

    m_int = m_ref[0:1, :]              # interior mask (1, S_pad), f32
    b_l = m_ref[1:2, :] > 0.5
    b_r = m_ref[2:3, :] > 0.5
    b_t = m_ref[3:4, :] > 0.5
    b_b = m_ref[4:5, :] > 0.5

    def reflect_fix(u):
        # Rewrite only the 4 border strips of the padded layout with their
        # reflections (columns first so the corners come out right).
        u = jnp.where(b_l, shift_read(u, 2), u)          # col 0    <- col 2
        u = jnp.where(b_r, shift_read(u, -2), u)         # col Wp-1 <- col W-1
        u = jnp.where(b_t, shift_read(u, 2 * Wp), u)     # row 0    <- row 2
        u = jnp.where(b_b, shift_read(u, -2 * Wp), u)    # row Hp-1 <- row H-1
        return u

    def conv3x3_instnorm(p, w_ref):
        # p: (C, S_pad) reflect-padded flat activation (f32).
        # dw-stacked activation (K = 3*C), shared by all three dh matmuls so
        # the per-tap accumulation over dw happens inside the MXU.
        q = jnp.concatenate([shift_read(p, -1), p, shift_read(p, 1)], axis=0)
        acc = None
        for dh in range(3):
            z = jnp.dot(w_ref[dh].astype(jnp.float32), q,
                        preferred_element_type=jnp.float32)
            z = shift_read(z, (dh - 1) * Wp)              # row-tap offset (XLU)
            acc = z if acc is None else acc + z
        # InstanceNorm over the interior only (two-pass, f32, biased variance).
        # Conv bias is omitted: the mean subtraction cancels it exactly.
        mu = jnp.sum(acc * m_int, axis=1, keepdims=True) * inv_hw
        yc = (acc - mu) * m_int                           # borders/tail -> 0
        var = jnp.sum(yc * yc, axis=1, keepdims=True) * inv_hw
        return yc * lax.rsqrt(var + EPS)

    x = x_ref[0].astype(jnp.float32)                      # (C, S_pad)
    y1 = conv3x3_instnorm(reflect_fix(x), w1_ref)
    y2 = conv3x3_instnorm(reflect_fix(y1), w2_ref)
    o_ref[0] = (x + y2).astype(o_ref.dtype)               # residual (interior)


def _vmem_limit_bytes():
    """Generation-aware VMEM cap (leave ~8 MiB headroom; ~56 MiB on v7x)."""
    try:
        cap = int(pltpu.get_tpu_info().vmem_capacity_bytes)
    except Exception:
        cap = 64 * 1024 * 1024   # conservative (v7x per-TensorCore VMEM)
    return int(min(cap - 8 * 1024 * 1024, 112 * 1024 * 1024))


@jax.jit
def residual_block(x, w1, b1, w2, b2):
    """ResidualBlock forward.  x: (N, C, H, W) NCHW; weights OIHW (PyTorch).

    Conv biases accepted for API parity but unused: the non-affine
    InstanceNorm's spatial mean subtraction cancels them exactly.
    """
    del b1, b2
    N, C, H, W = x.shape
    Hp, Wp = H + 2, W + 2
    S = Hp * Wp
    S_pad = ((S + 127) // 128) * 128          # lane-align flat padded axis
    Cp = ((C + 7) // 8) * 8                   # sublane-align channels

    # Weights OIHW -> (dh, C_out, 3*C_in) grouped by dh (columns dw-major),
    # channel-padded with zeros so every in-kernel sublane op is tile-aligned.
    def regroup(w):
        w = jnp.transpose(w, (2, 0, 3, 1))                       # (kh,o,kw,i)
        w = jnp.pad(w, ((0, 0), (0, Cp - C), (0, 0), (0, Cp - C)))
        return w.reshape(3, Cp, 3 * Cp)

    wg1, wg2 = regroup(w1), regroup(w2)

    # Zero-pad x into the flat padded layout once (layout plumbing only); the
    # kernel fills the reflect borders in-register.
    x_p = jnp.pad(x, ((0, 0), (0, Cp - C), (1, 1), (1, 1))).reshape(N, Cp, S)
    x_p = jnp.pad(x_p, ((0, 0), (0, 0), (0, S_pad - S)))

    # Interior / border-strip masks over the flat padded axis.
    pos = jnp.arange(S_pad)
    row, col = pos // Wp, pos % Wp
    valid = pos < S
    zeros = jnp.zeros_like(valid)
    masks = jnp.stack([
        valid & (row >= 1) & (row <= H) & (col >= 1) & (col <= W),  # interior
        valid & (col == 0),                                         # left
        valid & (col == Wp - 1),                                    # right
        valid & (row == 0),                                         # top
        valid & (row == Hp - 1),                                    # bottom
        zeros, zeros, zeros,
    ]).astype(jnp.float32)                                          # (8, S_pad)

    kern = functools.partial(_residual_block_kernel, C=Cp, H=H, W=W, S_pad=S_pad)
    out_p = pl.pallas_call(
        kern,
        out_shape=jax.ShapeDtypeStruct((N, Cp, S_pad), x.dtype),
        grid=(N,),
        in_specs=[
            pl.BlockSpec((1, Cp, S_pad), lambda n: (n, 0, 0)),
            pl.BlockSpec((8, S_pad), lambda n: (0, 0)),
            # Constant index_map: fetched once; single-buffering them would
            # reclaim a few MiB at C=256 on v7x (left default for portability).
            pl.BlockSpec((3, Cp, 3 * Cp), lambda n: (0, 0, 0)),
            pl.BlockSpec((3, Cp, 3 * Cp), lambda n: (0, 0, 0)),
        ],
        out_specs=pl.BlockSpec((1, Cp, S_pad), lambda n: (n, 0, 0)),
        compiler_params=pltpu.CompilerParams(
            dimension_semantics=("parallel",),
            vmem_limit_bytes=_vmem_limit_bytes(),
        ),
    )(x_p, masks, wg1, wg2)

    # Back to NCHW: drop channel padding, lane tail and the spatial border.
    out = out_p[:, :C, :S].reshape(N, C, Hp, Wp)[:, :, 1:H + 1, 1:W + 1]
    return out


def _ref_forward(x, w1, b1, w2, b2):
    """Pure-JAX reference mirroring the PyTorch module (NCHW, with conv bias)."""

    def stage(inp, w, b):
        p = jnp.pad(inp, ((0, 0), (0, 0), (1, 1), (1, 1)), mode="reflect")
        y = lax.conv_general_dilated(
            p, w, window_strides=(1, 1), padding="VALID",
            dimension_numbers=("NCHW", "OIHW", "NCHW"),
            precision=lax.Precision.HIGHEST)
        y = y + b.reshape(1, -1, 1, 1)
        mu = jnp.mean(y, axis=(2, 3), keepdims=True)
        var = jnp.mean((y - mu) ** 2, axis=(2, 3), keepdims=True)
        return (y - mu) * lax.rsqrt(var + EPS)

    return x + stage(stage(x, w1, b1), w2, b2)


if __name__ == "__main__":
    N, C, H, W = 2, 4, 16, 16

    key = jax.random.PRNGKey(0)
    k_x, k_w1, k_b1, k_w2, k_b2 = jax.random.split(key, 5)

    # Deterministic PyTorch-style init (uniform bound = 1/sqrt(fan_in)).
    fan_in = C * 3 * 3
    bound = 1.0 / (fan_in ** 0.5)
    w1 = jax.random.uniform(k_w1, (C, C, 3, 3), jnp.float32, -bound, bound)  # OIHW
    b1 = jax.random.uniform(k_b1, (C,), jnp.float32, -bound, bound)
    w2 = jax.random.uniform(k_w2, (C, C, 3, 3), jnp.float32, -bound, bound)
    b2 = jax.random.uniform(k_b2, (C,), jnp.float32, -bound, bound)

    x = jax.random.normal(k_x, (N, C, H, W), jnp.float32)

    out = jax.block_until_ready(residual_block(x, w1, b1, w2, b2))
    ref = jax.block_until_ready(_ref_forward(x, w1, b1, w2, b2))

    assert out.shape == (N, C, H, W)
    assert jnp.allclose(out, ref, atol=1e-4, rtol=1e-4), "mismatch vs reference"

    print("KERNEL_OK")
</pallas_src>

<mosaic_0001>
module attributes {stable_mosaic.version = 11 : i64} {
  func.func @_residual_block_kernel(%arg0: i32, %arg1: memref<1x8x384xf32, #tpu.memory_space<vmem>>, %arg2: memref<8x384xf32, #tpu.memory_space<vmem>>, %arg3: memref<3x8x24xf32, #tpu.memory_space<vmem>>, %arg4: memref<3x8x24xf32, #tpu.memory_space<vmem>>, %arg5: memref<1x8x384xf32, #tpu.memory_space<vmem>>) attributes {dimension_semantics = [#tpu.dimension_semantics<parallel>], iteration_bounds = array<i64: 2>, scalar_prefetch = 0 : i64, scratch_operands = 0 : i64, tpu.core_type = #tpu.core_type<tc>, window_params = [{transform_indices = @transform_0, window_bounds = array<i64: 1, 8, 384>}, {pipeline_mode = #tpu.pipeline_mode<synchronous>, transform_indices = @transform_1, window_bounds = array<i64: 8, 384>}, {pipeline_mode = #tpu.pipeline_mode<synchronous>, transform_indices = @transform_2, window_bounds = array<i64: 3, 8, 24>}, {pipeline_mode = #tpu.pipeline_mode<synchronous>, transform_indices = @transform_3, window_bounds = array<i64: 3, 8, 24>}, {transform_indices = @transform_4, window_bounds = array<i64: 1, 8, 384>}]} {
    %c0 = arith.constant 0 : index
    %c0_0 = arith.constant 0 : index
    %0 = vector.load %arg2[%c0, %c0_0] : memref<8x384xf32, #tpu.memory_space<vmem>>, vector<1x384xf32>
    %c1 = arith.constant 1 : index
    %c0_1 = arith.constant 0 : index
    %1 = vector.load %arg2[%c1, %c0_1] : memref<8x384xf32, #tpu.memory_space<vmem>>, vector<1x384xf32>
    %cst = arith.constant 5.000000e-01 : f32
    %2 = vector.broadcast %cst : f32 to vector<1x384xf32>
    %3 = arith.cmpf ogt, %1, %2 : vector<1x384xf32>
    %c2 = arith.constant 2 : index
    %c0_2 = arith.constant 0 : index
    %4 = vector.load %arg2[%c2, %c0_2] : memref<8x384xf32, #tpu.memory_space<vmem>>, vector<1x384xf32>
    %cst_3 = arith.constant 5.000000e-01 : f32
    %5 = vector.broadcast %cst_3 : f32 to vector<1x384xf32>
    %6 = arith.cmpf ogt, %4, %5 : vector<1x384xf32>
    %c3 = arith.constant 3 : index
    %c0_4 = arith.constant 0 : index
    %7 = vector.load %arg2[%c3, %c0_4] : memref<8x384xf32, #tpu.memory_space<vmem>>, vector<1x384xf32>
    %cst_5 = arith.constant 5.000000e-01 : f32
    %8 = vector.broadcast %cst_5 : f32 to vector<1x384xf32>
    %9 = arith.cmpf ogt, %7, %8 : vector<1x384xf32>
    %c4 = arith.constant 4 : index
    %c0_6 = arith.constant 0 : index
    %10 = vector.load %arg2[%c4, %c0_6] : memref<8x384xf32, #tpu.memory_space<vmem>>, vector<1x384xf32>
    %cst_7 = arith.constant 5.000000e-01 : f32
    %11 = vector.broadcast %cst_7 : f32 to vector<1x384xf32>
    %12 = arith.cmpf ogt, %10, %11 : vector<1x384xf32>
    %c0_8 = arith.constant 0 : index
    %c0_9 = arith.constant 0 : index
    %c0_10 = arith.constant 0 : index
    %13 = vector.load %arg1[%c0_8, %c0_9, %c0_10] : memref<1x8x384xf32, #tpu.memory_space<vmem>>, vector<1x8x384xf32>
    %14 = vector.shape_cast %13 : vector<1x8x384xf32> to vector<8x384xf32>
    %c382_i32 = arith.constant 382 : i32
    %15 = tpu.dynamic_rotate %14 by %c382_i32 dim 1 : vector<8x384xf32>, i32 -> vector<8x384xf32>
    %16 = vector.shape_cast %3 : vector<1x384xi1> to vector<1x384xi1>
    %17 = vector.broadcast %16 : vector<1x384xi1> to vector<8x384xi1>
    %18 = arith.select %17, %15, %14 : vector<8x384xi1>, vector<8x384xf32>
    %c2_i32 = arith.constant 2 : i32
    %19 = tpu.dynamic_rotate %18 by %c2_i32 dim 1 : vector<8x384xf32>, i32 -> vector<8x384xf32>
    %20 = vector.shape_cast %6 : vector<1x384xi1> to vector<1x384xi1>
    %21 = vector.broadcast %20 : vector<1x384xi1> to vector<8x384xi1>
    %22 = arith.select %21, %19, %18 : vector<8x384xi1>, vector<8x384xf32>
    %c348_i32 = arith.constant 348 : i32
    %23 = tpu.dynamic_rotate %22 by %c348_i32 dim 1 : vector<8x384xf32>, i32 -> vector<8x384xf32>
    %24 = vector.shape_cast %9 : vector<1x384xi1> to vector<1x384xi1>
    %25 = vector.broadcast %24 : vector<1x384xi1> to vector<8x384xi1>
    %26 = arith.select %25, %23, %22 : vector<8x384xi1>, vector<8x384xf32>
    %c36_i32 = arith.constant 36 : i32
    %27 = tpu.dynamic_rotate %26 by %c36_i32 dim 1 : vector<8x384xf32>, i32 -> vector<8x384xf32>
    %28 = vector.shape_cast %12 : vector<1x384xi1> to vector<1x384xi1>
    %29 = vector.broadcast %28 : vector<1x384xi1> to vector<8x384xi1>
    %30 = arith.select %29, %27, %26 : vector<8x384xi1>, vector<8x384xf32>
    %c1_i32 = arith.constant 1 : i32
    %31 = tpu.dynamic_rotate %30 by %c1_i32 dim 1 : vector<8x384xf32>, i32 -> vector<8x384xf32>
    %c383_i32 = arith.constant 383 : i32
    %32 = tpu.dynamic_rotate %30 by %c383_i32 dim 1 : vector<8x384xf32>, i32 -> vector<8x384xf32>
    %33 = tpu.concatenate %31, %30, %32 in 0 : vector<8x384xf32>, vector<8x384xf32>, vector<8x384xf32> -> vector<24x384xf32>
    %c0_11 = arith.constant 0 : index
    %c0_12 = arith.constant 0 : index
    %c0_13 = arith.constant 0 : index
    %34 = vector.load %arg3[%c0_11, %c0_12, %c0_13] : memref<3x8x24xf32, #tpu.memory_space<vmem>>, vector<1x8x24xf32>
    %35 = vector.shape_cast %34 : vector<1x8x24xf32> to vector<8x24xf32>
    %cst_14 = arith.constant dense<0.000000e+00> : vector<8x384xf32>
    %36 = tpu.matmul %35, %33, %cst_14 {dimension_numbers = #tpu.dot_dimension_numbers<[1], [0], [0], [1], [0, 0, 1, 1], [], []>} : vector<8x24xf32>, vector<24x384xf32>, vector<8x384xf32> -> vector<8x384xf32>
    %c18_i32 = arith.constant 18 : i32
    %37 = tpu.dynamic_rotate %36 by %c18_i32 dim 1 : vector<8x384xf32>, i32 -> vector<8x384xf32>
    %c1_15 = arith.constant 1 : index
    %c0_16 = arith.constant 0 : index
    %c0_17 = arith.constant 0 : index
    %38 = vector.load %arg3[%c1_15, %c0_16, %c0_17] : memref<3x8x24xf32, #tpu.memory_space<vmem>>, vector<1x8x24xf32>
    %39 = vector.shape_cast %38 : vector<1x8x24xf32> to vector<8x24xf32>
    %cst_18 = arith.constant dense<0.000000e+00> : vector<8x384xf32>
    %40 = tpu.matmul %39, %33, %cst_18 {dimension_numbers = #tpu.dot_dimension_numbers<[1], [0], [0], [1], [0, 0, 1, 1], [], []>} : vector<8x24xf32>, vector<24x384xf32>, vector<8x384xf32> -> vector<8x384xf32>
    %41 = arith.addf %37, %40 : vector<8x384xf32>
    %c2_19 = arith.constant 2 : index
    %c0_20 = arith.constant 0 : index
    %c0_21 = arith.constant 0 : index
    %42 = vector.load %arg3[%c2_19, %c0_20, %c0_21] : memref<3x8x24xf32, #tpu.memory_space<vmem>>, vector<1x8x24xf32>
    %43 = vector.shape_cast %42 : vector<1x8x24xf32> to vector<8x24xf32>
    %cst_22 = arith.constant dense<0.000000e+00> : vector<8x384xf32>
    %44 = tpu.matmul %43, %33, %cst_22 {dimension_numbers = #tpu.dot_dimension_numbers<[1], [0], [0], [1], [0, 0, 1, 1], [], []>} : vector<8x24xf32>, vector<24x384xf32>, vector<8x384xf32> -> vector<8x384xf32>
    %c366_i32 = arith.constant 366 : i32
    %45 = tpu.dynamic_rotate %44 by %c366_i32 dim 1 : vector<8x384xf32>, i32 -> vector<8x384xf32>
    %46 = arith.addf %41, %45 : vector<8x384xf32>
    %47 = vector.broadcast %0 : vector<1x384xf32> to vector<8x384xf32>
    %48 = arith.mulf %46, %47 : vector<8x384xf32>
    %cst_23 = arith.constant dense<0.000000e+00> : vector<8xf32>
    %49 = vector.multi_reduction <add>, %48, %cst_23 [1] : vector<8x384xf32> to vector<8xf32>
    %50 = vector.shape_cast %49 : vector<8xf32> to vector<8x1xf32>
    %cst_24 = arith.constant 3.906250e-03 : f32
    %51 = vector.broadcast %cst_24 : f32 to vector<8x1xf32>
    %52 = arith.mulf %50, %51 : vector<8x1xf32>
    %53 = vector.broadcast %52 : vector<8x1xf32> to vector<8x384xf32>
    %54 = arith.subf %46, %53 : vector<8x384xf32>
    %55 = vector.broadcast %0 : vector<1x384xf32> to vector<8x384xf32>
    %56 = arith.mulf %54, %55 : vector<8x384xf32>
    %57 = arith.mulf %56, %56 : vector<8x384xf32>
    %cst_25 = arith.constant dense<0.000000e+00> : vector<8xf32>
    %58 = vector.multi_reduction <add>, %57, %cst_25 [1] : vector<8x384xf32> to vector<8xf32>
    %59 = vector.shape_cast %58 : vector<8xf32> to vector<8x1xf32>
    %cst_26 = arith.constant 3.906250e-03 : f32
    %60 = vector.broadcast %cst_26 : f32 to vector<8x1xf32>
    %61 = arith.mulf %59, %60 : vector<8x1xf32>
    %cst_27 = arith.constant 9.99999974E-6 : f32
    %62 = vector.broadcast %cst_27 : f32 to vector<8x1xf32>
    %63 = arith.addf %61, %62 : vector<8x1xf32>
    %64 = math.rsqrt %63 : vector<8x1xf32>
    %65 = vector.broadcast %64 : vector<8x1xf32> to vector<8x384xf32>
    %66 = arith.mulf %56, %65 : vector<8x384xf32>
    %c382_i32_28 = arith.constant 382 : i32
    %67 = tpu.dynamic_rotate %66 by %c382_i32_28 dim 1 : vector<8x384xf32>, i32 -> vector<8x384xf32>
    %68 = vector.shape_cast %3 : vector<1x384xi1> to vector<1x384xi1>
    %69 = vector.broadcast %68 : vector<1x384xi1> to vector<8x384xi1>
    %70 = arith.select %69, %67, %66 : vector<8x384xi1>, vector<8x384xf32>
    %c2_i32_29 = arith.constant 2 : i32
    %71 = tpu.dynamic_rotate %70 by %c2_i32_29 dim 1 : vector<8x384xf32>, i32 -> vector<8x384xf32>
    %72 = vector.shape_cast %6 : vector<1x384xi1> to vector<1x384xi1>
    %73 = vector.broadcast %72 : vector<1x384xi1> to vector<8x384xi1>
    %74 = arith.select %73, %71, %70 : vector<8x384xi1>, vector<8x384xf32>
    %c348_i32_30 = arith.constant 348 : i32
    %75 = tpu.dynamic_rotate %74 by %c348_i32_30 dim 1 : vector<8x384xf32>, i32 -> vector<8x384xf32>
    %76 = vector.shape_cast %9 : vector<1x384xi1> to vector<1x384xi1>
    %77 = vector.broadcast %76 : vector<1x384xi1> to vector<8x384xi1>
    %78 = arith.select %77, %75, %74 : vector<8x384xi1>, vector<8x384xf32>
    %c36_i32_31 = arith.constant 36 : i32
    %79 = tpu.dynamic_rotate %78 by %c36_i32_31 dim 1 : vector<8x384xf32>, i32 -> vector<8x384xf32>
    %80 = vector.shape_cast %12 : vector<1x384xi1> to vector<1x384xi1>
    %81 = vector.broadcast %80 : vector<1x384xi1> to vector<8x384xi1>
    %82 = arith.select %81, %79, %78 : vector<8x384xi1>, vector<8x384xf32>
    %c1_i32_32 = arith.constant 1 : i32
    %83 = tpu.dynamic_rotate %82 by %c1_i32_32 dim 1 : vector<8x384xf32>, i32 -> vector<8x384xf32>
    %c383_i32_33 = arith.constant 383 : i32
    %84 = tpu.dynamic_rotate %82 by %c383_i32_33 dim 1 : vector<8x384xf32>, i32 -> vector<8x384xf32>
    %85 = tpu.concatenate %83, %82, %84 in 0 : vector<8x384xf32>, vector<8x384xf32>, vector<8x384xf32> -> vector<24x384xf32>
    %c0_34 = arith.constant 0 : index
    %c0_35 = arith.constant 0 : index
    %c0_36 = arith.constant 0 : index
    %86 = vector.load %arg4[%c0_34, %c0_35, %c0_36] : memref<3x8x24xf32, #tpu.memory_space<vmem>>, vector<1x8x24xf32>
    %87 = vector.shape_cast %86 : vector<1x8x24xf32> to vector<8x24xf32>
    %cst_37 = arith.constant dense<0.000000e+00> : vector<8x384xf32>
    %88 = tpu.matmul %87, %85, %cst_37 {dimension_numbers = #tpu.dot_dimension_numbers<[1], [0], [0], [1], [0, 0, 1, 1], [], []>} : vector<8x24xf32>, vector<24x384xf32>, vector<8x384xf32> -> vector<8x384xf32>
    %c18_i32_38 = arith.constant 18 : i32
    %89 = tpu.dynamic_rotate %88 by %c18_i32_38 dim 1 : vector<8x384xf32>, i32 -> vector<8x384xf32>
    %c1_39 = arith.constant 1 : index
    %c0_40 = arith.constant 0 : index
    %c0_41 = arith.constant 0 : index
    %90 = vector.load %arg4[%c1_39, %c0_40, %c0_41] : memref<3x8x24xf32, #tpu.memory_space<vmem>>, vector<1x8x24xf32>
    %91 = vector.shape_cast %90 : vector<1x8x24xf32> to vector<8x24xf32>
    %cst_42 = arith.constant dense<0.000000e+00> : vector<8x384xf32>
    %92 = tpu.matmul %91, %85, %cst_42 {dimension_numbers = #tpu.dot_dimension_numbers<[1], [0], [0], [1], [0, 0, 1, 1], [], []>} : vector<8x24xf32>, vector<24x384xf32>, vector<8x384xf32> -> vector<8x384xf32>
    %93 = arith.addf %89, %92 : vector<8x384xf32>
    %c2_43 = arith.constant 2 : index
    %c0_44 = arith.constant 0 : index
    %c0_45 = arith.constant 0 : index
    %94 = vector.load %arg4[%c2_43, %c0_44, %c0_45] : memref<3x8x24xf32, #tpu.memory_space<vmem>>, vector<1x8x24xf32>
    %95 = vector.shape_cast %94 : vector<1x8x24xf32> to vector<8x24xf32>
    %cst_46 = arith.constant dense<0.000000e+00> : vector<8x384xf32>
    %96 = tpu.matmul %95, %85, %cst_46 {dimension_numbers = #tpu.dot_dimension_numbers<[1], [0], [0], [1], [0, 0, 1, 1], [], []>} : vector<8x24xf32>, vector<24x384xf32>, vector<8x384xf32> -> vector<8x384xf32>
    %c366_i32_47 = arith.constant 366 : i32
    %97 = tpu.dynamic_rotate %96 by %c366_i32_47 dim 1 : vector<8x384xf32>, i32 -> vector<8x384xf32>
    %98 = arith.addf %93, %97 : vector<8x384xf32>
    %99 = vector.broadcast %0 : vector<1x384xf32> to vector<8x384xf32>
    %100 = arith.mulf %98, %99 : vector<8x384xf32>
    %cst_48 = arith.constant dense<0.000000e+00> : vector<8xf32>
    %101 = vector.multi_reduction <add>, %100, %cst_48 [1] : vector<8x384xf32> to vector<8xf32>
    %102 = vector.shape_cast %101 : vector<8xf32> to vector<8x1xf32>
    %cst_49 = arith.constant 3.906250e-03 : f32
    %103 = vector.broadcast %cst_49 : f32 to vector<8x1xf32>
    %104 = arith.mulf %102, %103 : vector<8x1xf32>
    %105 = vector.broadcast %104 : vector<8x1xf32> to vector<8x384xf32>
    %106 = arith.subf %98, %105 : vector<8x384xf32>
    %107 = vector.broadcast %0 : vector<1x384xf32> to vector<8x384xf32>
    %108 = arith.mulf %106, %107 : vector<8x384xf32>
    %109 = arith.mulf %108, %108 : vector<8x384xf32>
    %cst_50 = arith.constant dense<0.000000e+00> : vector<8xf32>
    %110 = vector.multi_reduction <add>, %109, %cst_50 [1] : vector<8x384xf32> to vector<8xf32>
    %111 = vector.shape_cast %110 : vector<8xf32> to vector<8x1xf32>
    %cst_51 = arith.constant 3.906250e-03 : f32
    %112 = vector.broadcast %cst_51 : f32 to vector<8x1xf32>
    %113 = arith.mulf %111, %112 : vector<8x1xf32>
    %cst_52 = arith.constant 9.99999974E-6 : f32
    %114 = vector.broadcast %cst_52 : f32 to vector<8x1xf32>
    %115 = arith.addf %113, %114 : vector<8x1xf32>
    %116 = math.rsqrt %115 : vector<8x1xf32>
    %117 = vector.broadcast %116 : vector<8x1xf32> to vector<8x384xf32>
    %118 = arith.mulf %108, %117 : vector<8x384xf32>
    %119 = arith.addf %14, %118 : vector<8x384xf32>
    %c0_53 = arith.constant 0 : index
    %c0_54 = arith.constant 0 : index
    %c0_55 = arith.constant 0 : index
    %120 = vector.load %arg5[%c0_53, %c0_54, %c0_55] : memref<1x8x384xf32, #tpu.memory_space<vmem>>, vector<1x8x384xf32>
    %121 = vector.shape_cast %120 : vector<1x8x384xf32> to vector<8x384xf32>
    %122 = vector.shape_cast %119 : vector<8x384xf32> to vector<1x8x384xf32>
    tpu.vector_store %arg5[%c0_53, %c0_54, %c0_55], %122 {strides = array<i32>} : memref<1x8x384xf32, #tpu.memory_space<vmem>>, vector<1x8x384xf32>,
    return
  }
  func.func @transform_0(%arg0: i32) -> (i32, i32, i32) {
    %c0_i32 = arith.constant 0 : i32
    %c0_i32_0 = arith.constant 0 : i32
    %c0_i32_1 = arith.constant 0 : i32
    return %arg0, %c0_i32, %c0_i32_0 : i32, i32, i32
  }
  func.func @transform_1(%arg0: i32) -> (i32, i32) {
    %c0_i32 = arith.constant 0 : i32
    %c0_i32_0 = arith.constant 0 : i32
    %c0_i32_1 = arith.constant 0 : i32
    return %c0_i32, %c0_i32_0 : i32, i32
  }
  func.func @transform_2(%arg0: i32) -> (i32, i32, i32) {
    %c0_i32 = arith.constant 0 : i32
    %c0_i32_0 = arith.constant 0 : i32
    %c0_i32_1 = arith.constant 0 : i32
    %c0_i32_2 = arith.constant 0 : i32
    return %c0_i32, %c0_i32_0, %c0_i32_1 : i32, i32, i32
  }
  func.func @transform_3(%arg0: i32) -> (i32, i32, i32) {
    %c0_i32 = arith.constant 0 : i32
    %c0_i32_0 = arith.constant 0 : i32
    %c0_i32_1 = arith.constant 0 : i32
    %c0_i32_2 = arith.constant 0 : i32
    return %c0_i32, %c0_i32_0, %c0_i32_1 : i32, i32, i32
  }
  func.func @transform_4(%arg0: i32) -> (i32, i32, i32) {
    %c0_i32 = arith.constant 0 : i32
    %c0_i32_0 = arith.constant 0 : i32
    %c0_i32_1 = arith.constant 0 : i32
    return %arg0, %c0_i32, %c0_i32_0 : i32, i32, i32
  }
}

</mosaic_0001>

<bundles_post_ra>
// kernel: residual_block.1
= control target key start
LH: loop header
LB: loop body
LE: loop exit
PB: predicated region body
PF: predicated region fallthrough
CT: control target
= control target key end

     0   :  { %s1703_s15 = smov 0   ;;  %s2108_s0 = inlined_call_operand.vmem [shape: f32[2,8,384], index: 0, kind: input, shape index: {}]   ;;  %s2109_s1 = inlined_call_operand.vmem [shape: f32[8,384], index: 1, kind: input, shape index: {}]   ;;  %s2110_s2 = inlined_call_operand.vmem [shape: f32[3,8,24], index: 2, kind: input, shape index: {}]   ;;  %s2111_s3 = inlined_call_operand.vmem [shape: f32[3,8,24], index: 3, kind: input, shape index: {}]   ;;  %s2112_s4 = inlined_call_operand.vmem [shape: f32[2,8,384], index: 4, kind: output, shape index: {}]  }
   0x1 LB: > { %s1474_s16 = sadd.s32 4294967295, %s1664_s15   ;;  %p1478_p0 = scmp.ge.s32.totalorder %s1664_s15, 1  ;;  %s1664_s15 = sphi %s1703_s15, %s14_s15  }
   0x2   : > { %p162_p1 = scmp.lt.s32.totalorder %s1664_s15, 3 }
   0x4   : > { %p163_p2 = pnand %p1478_p0, %p162_p1 }
   0x5   : > { %p188_p3 = scmp.lt.s32.totalorder (!%p163_p2), %s1474_s16, 1  ;;  %s1666_s21 = smov (!%p163_p2), 126   ;;  %v220_v3 = vlaneseq (!%p163_p2)  ;;  %v1481_v4 = vld [vmem:[%s2109_s1 + $0x1] ss:$8 sm:$0x7] (!%p163_p2)  ;;  %v1667_v8 = vmov (!%p163_p2), 0  }
   0x6   : > { %166 = sbr.rel (%p163_p2) target bundleno = 2568 (0xa08), region = 36  ;;  %vm201_vm0 = vcmp.gt.f32.partialorder (!%p163_p2), %v1481_v4, 0.5  ;;  %s1668_s24 = smov (!%p163_p2), 2   ;;  %v1482_v27 = vld [vmem:[%s2109_s1 + $0x2] ss:$8 sm:$0x7] (!%p163_p2) }
   0x7   : > { %v228_v5 = vshrl.u32 (!%p163_p2), %v220_v3, 7  ;;  %v226_v9 = vsel (!%p163_p2), %vm201_vm0, 1, %v1667_v8  ;;  %v1743_v13 = vand.u32 (!%p163_p2), 127, %v220_v3  ;;  %vm204_vm5 = vcmp.gt.f32.partialorder (!%p163_p2), %v1482_v27, 0.5  ;;  %s1669_s27 = smov (!%p163_p2), 92   ;;  %s1670_s30 = smov (!%p163_p2), 36  }
   0x8   : > { %v255_v28 = vsel (!%p163_p2), %vm204_vm5, 1, %v1667_v8  ;;  %v1483_v44 = vld [vmem:[%s2109_s1 + $0x3] ss:$8 sm:$0x7] (!%p163_p2)  ;;  %s1674_s7 = smov (!%p163_p2), 1   ;;  %s1675_s8 = smov (!%p163_p2), 127  }
   0x9   : > { %v1734_v6 = vsub.s32 (!%p163_p2), 0, %v228_v5  ;;  %v1736_v7 = vsub.s32 (!%p163_p2), 1, %v228_v5  ;;  %v1741_v12 = vsub.s32 (!%p163_p2), 2, %v228_v5  ;;  %vm222_vm3 = vcmp.lt.s32.totalorder (!%p163_p2), %v1743_v13, 126  ;;  %s1676_s18 = smov (!%p163_p2), 18   ;;  %s1677_s19 = smov (!%p163_p2), 110  }
   0xa   : > { %vm2115_vm6 = vcmp.lt.s32.totalorder (!%p163_p2), %v1743_v13, 2  ;;  %vm207_vm10 = vcmp.gt.f32.partialorder (!%p163_p2), %v1483_v44, 0.5  ;;  %vm2113_vm11 = vcmp.lt.s32.totalorder (!%p163_p2), %v1743_v13, 92  ;;  %v1484_v61 = vld [vmem:[%s2109_s1 + $0x4] ss:$8 sm:$0x7] (!%p163_p2) }
   0xb   : > { %v230_v10 = vrot.slane (!%p163_p2), %v226_v9, %v1734_v6  ;;  %v234_v11 = vrot.slane (!%p163_p2), %v226_v9, %v1736_v7  ;;  %v238_v17 = vrot.slane (!%p163_p2), %v226_v9, %v1741_v12  ;;  %v263_v29 = vrot.slane (!%p163_p2), %v255_v28, %v1736_v7  ;;  %v352_v44 = vld [vmem:[%s2110_s2] sm:$0xff] (!%p163_p2) }
   0xc   : > { %v259_v31 = vrot.slane (!%p163_p2), %v255_v28, %v1734_v6  ;;  %v267_v37 = vrot.slane (!%p163_p2), %v255_v28, %v1741_v12  ;;  %v284_v45 = vsel (!%p163_p2), %vm207_vm10, 1, %v1667_v8  ;;  %vm210_vm15 = vcmp.gt.f32.partialorder (!%p163_p2), %v1484_v61, 0.5 }
   0xd   : > { %s2168_s16 = smov (!%p188_p3, %s1474_s16), 1  ;;  %vm1745_vm1 = vcmp.eq.s32.totalorder %v230_v10, 1  ;;  %vm1749_vm2 = vcmp.eq.s32.totalorder %v234_v11, 1  ;;  %vm1769_vm4 = vcmp.eq.s32.totalorder %v238_v17, 1  ;;  %vm1783_vm7 = vcmp.eq.s32.totalorder %v263_v29, 1 }
   0xe   : > { %s1623_s17 = smul.u32 24, %s2168_s16  ;;  %vm1793_vm8 = vcmp.eq.s32.totalorder %v259_v31, 1  ;;  %vm1805_vm9 = vcmp.eq.s32.totalorder %v267_v37, 1  ;;  %v288_v46 = vrot.slane %v284_v45, %v1734_v6  ;;  %v296_v48 = vrot.slane %v284_v45, %v1741_v12 }
   0xf   : > { %v292_v49 = vrot.slane %v284_v45, %v1736_v7  ;;  %v313_v62 = vsel %vm210_vm15, 1, %v1667_v8  ;;  %v1671_v9 = vmov 0.0|0.0   ;;  %vm2114_vm0 = vcmp.lt.s32.totalorder %v1743_v13, 36 }
  0x10   : > { %s192_s20 = scalar_lea.vmem %s2108_s0, %s1623_s17  ;;  %vm1818_vm12 = vcmp.eq.s32.totalorder %v288_v46, 1  ;;  %vm1829_vm13 = vcmp.eq.s32.totalorder %v296_v48, 1  ;;  %v317_v63 = vrot.slane %v313_v62, %v1734_v6  ;;  %v321_v3 = vrot.slane %v313_v62, %v1736_v7  ;;  %1585 = vmatprep.subr.bf16.mxu1 %v1671_v9  ;;  %v1487_v48 = vld [vmem:[%s2110_s2 + $0x8] sm:$0xff] }
  0x11   : > { %v1719_v0 = vld [vmem:[%s192_s20 + $0x10] sm:$0xff]  ;;  %v1721_v1 = vld [vmem:[%s192_s20] sm:$0xff]  ;;  %v1727_v2 = vld [vmem:[%s192_s20 + $0x8] sm:$0xff]  ;;  %vm1833_vm14 = vcmp.eq.s32.totalorder %v292_v49, 1  ;;  %v325_v4 = vrot.slane %v313_v62, %v1741_v12 }
  0x12   : > { %218 = vrot.lane.b32.xlu1 %v1719_v0, %s1666_s21  ;;  %214 = vrot.lane.b32.xlu0 %v1721_v1, %s1666_s21  ;;  %vm1856_vm5 = vcmp.eq.s32.totalorder %v317_v63, 1  ;;  %vm1860_vm10 = vcmp.eq.s32.totalorder %v321_v3, 1  ;;  %v1490_v49 = vld [vmem:[%s2110_s2 + $0x10] sm:$0xff] }
  0x13   : > { %vm1864_vm15 = vcmp.eq.s32.totalorder %v325_v4, 1 }
  0x16   : > { %216 = vrot.lane.b32.xlu0 %v1727_v2, %s1666_s21 }
  0x84   : > { %v215_v14 = vpop.permute.xlu0 %214  ;;  %v219_v18 = vpop.permute.xlu1 %218 }
  0x85   : > { %v225_v24 = vsel %vm222_vm3, %v219_v18, %v215_v14 }
  0x86   : > { %v244_v26 = vsel %vm1769_vm4, %v225_v24, %v1719_v0 }
  0x88   : > { %v217_v19 = vpop.permute.xlu0 %216 }
  0x89   : > { %v223_v20 = vsel %vm222_vm3, %v217_v19, %v219_v18  ;;  %v224_v21 = vsel %vm222_vm3, %v215_v14, %v217_v19  ;;  %v1672_v18 = vmov 0.0  }
  0x8a   : > { %v242_v22 = vsel %vm1745_vm1, %v224_v21, %v1721_v1  ;;  %v243_v23 = vsel %vm1749_vm2, %v223_v20, %v1727_v2  ;;  %421 = vmatprep.mubr.f32.mxu0 %v1672_v18 }
  0x8b   : > { %245 = vrot.lane.b32.xlu1 %v242_v22, %s1668_s24  ;;  %247 = vrot.lane.b32.xlu0 %v243_v23, %s1668_s24 }
  0x8f   : > { %249 = vrot.lane.b32.xlu1 %v244_v26, %s1668_s24 }
  0xfd   : > { %v246_v32 = vpop.permute.xlu1 %245  ;;  %v248_v33 = vpop.permute.xlu0 %247 }
  0xfe   : > { %v253_v34 = vsel %vm2115_vm6, %v246_v32, %v248_v33 }
  0xff   : > { %v272_v35 = vsel %vm1783_vm7, %v253_v34, %v243_v23 }
 0x100   : > { %276 = vrot.lane.b32.xlu1 %v272_v35, %s1669_s27 }
 0x101   : > { %v250_v38 = vpop.permute.xlu1 %249 }
 0x102   : > { %v254_v39 = vsel %vm2115_vm6, %v250_v38, %v246_v32  ;;  %v252_v41 = vsel %vm2115_vm6, %v248_v33, %v250_v38  ;;  %vm348_vm6 = vcmp.lt.s32.totalorder %v1743_v13, 127 }
 0x103   : > { %v271_v40 = vsel %vm1793_vm8, %v254_v39, %v242_v22  ;;  %v273_v43 = vsel %vm1805_vm9, %v252_v41, %v244_v26 }
 0x104   : > { %274 = vrot.lane.b32.xlu0 %v271_v40, %s1669_s27 }
 0x108   : > { %278 = vrot.lane.b32.xlu0 %v273_v43, %s1669_s27 }
 0x172   : > { %v277_v50 = vpop.permute.xlu1 %276 }
 0x176   : > { %v275_v51 = vpop.permute.xlu0 %274 }
 0x177   : > { %v282_v52 = vsel %vm2113_vm11, %v275_v51, %v277_v50 }
 0x178   : > { %v300_v53 = vsel %vm1818_vm12, %v282_v52, %v271_v40 }
 0x179   : > { %303 = vrot.lane.b32.xlu1 %v300_v53, %s1670_s30 }
 0x17a   : > { %v279_v56 = vpop.permute.xlu0 %278 }
 0x17b   : > { %v281_v57 = vsel %vm2113_vm11, %v277_v50, %v279_v56  ;;  %v283_v58 = vsel %vm2113_vm11, %v279_v56, %v275_v51  ;;  %vm2117_vm11 = vmmov 0  }
 0x17c   : > { %v302_v59 = vsel %vm1829_vm13, %v283_v58, %v273_v43  ;;  %v301_v60 = vsel %vm1833_vm14, %v281_v57, %v272_v35  ;;  %1533 = vmatprep.mubr.msk.f32.mxu1 %vm2117_vm11, %v1672_v18 }
 0x17d   : > { %307 = vrot.lane.b32.xlu1 %v302_v59, %s1670_s30  ;;  %305 = vrot.lane.b32.xlu0 %v301_v60, %s1670_s30 }
 0x1eb   : > { %v304_v5 = vpop.permute.xlu1 %303 }
 0x1ef   : > { %v308_v14 = vpop.permute.xlu1 %307  ;;  %v306_v17 = vpop.permute.xlu0 %305 }
 0x1f0   : > { %v312_v19 = vsel %vm2114_vm0, %v308_v14, %v304_v5  ;;  %v310_v20 = vsel %vm2114_vm0, %v306_v17, %v308_v14  ;;  %v311_v21 = vsel %vm2114_vm0, %v304_v5, %v306_v17  ;;  %vm2116_vm0 = vcmp.lt.s32.totalorder %v1743_v13, 1 }
 0x1f1   : > { %v329_v22 = vsel %vm1856_vm5, %v312_v19, %v300_v53  ;;  %v330_v23 = vsel %vm1860_vm10, %v311_v21, %v301_v60  ;;  %v331_v24 = vsel %vm1864_vm15, %v310_v20, %v302_v59  ;;  %v198_v19 = vld [vmem:[%s2109_s1] ss:$8 sm:$0x7] }
 0x1f2   : > { %336 = vrot.lane.b32.xlu1 %v331_v24, %s1674_s7  ;;  %v1644_v26 = vpack.i.bf16 %v330_v23, %v329_v22 }
 0x1f4   : > { %1645 = vrot.lane.b32.xlu0 %v1644_v26, %s1674_s7  ;;  %v1952_v26 = vrot.slane %v198_v19, %v1734_v6 }
 0x1f6   : > { %346 = vrot.lane.b32.xlu1 %v331_v24, %s1675_s8 }
 0x1f8   : > { %344 = vrot.lane.b32.xlu0 %v330_v23, %s1675_s8 }
 0x1fc   : > { %342 = vrot.lane.b32.xlu0 %v329_v22, %s1675_s8 }
 0x264   : > { %v337_v27 = vpop.permute.xlu1 %336 }
 0x266   : > { %v1646_v28 = vpop.permute.xlu0 %1645 }
 0x267   : > { %v1648_v29 = vunpack.i.h.bf16 %v1646_v28  ;;  %v1647_v31 = vunpack.i.l.bf16 %v1646_v28 }
 0x268   : > { %v347_v40 = vpop.permute.xlu1 %346 }
 0x269   : > { %v340_v32 = vsel %vm2116_vm0, %v1647_v31, %v1648_v29  ;;  %v339_v33 = vsel %vm2116_vm0, %v1648_v29, %v337_v27  ;;  %v341_v34 = vsel %vm2116_vm0, %v337_v27, %v1647_v31  ;;  %vm2119_vm0 = vcmask 195584  }
 0x26a   : > { %v345_v35 = vpop.permute.xlu0 %344  ;;  %v1581_v37 = vpack.c.bf16 %v330_v23, %v340_v32  ;;  %v1586_v38 = vpack.c.bf16 %v331_v24, %v339_v33  ;;  %v1583_v39 = vpack.c.bf16 %v329_v22, %v341_v34  ;;  %v1955_v31 = vrot.slane %v198_v19, %v1736_v7 }
 0x26b   : > { %v349_v41 = vsel %vm348_vm6, %v345_v35, %v347_v40 }
 0x26c   : > { %1582 = vmatprep.subr.bf16.mxu0 %v1581_v37  ;;  %1587 = vmatpush3.bf16.msra.mxu1 %v1586_v38 }
 0x26d   : > { %1584 = vmatpush1.bf16.msra.mxu0 %v1583_v39  ;;  %1531 = vmatprep.subr.mxu1 %v1672_v18 }
 0x26e   : > { %v343_v43 = vpop.permute.xlu0 %342  ;;  %361 = vmatprep.subr.mxu0 %v349_v41 }
 0x26f   : > { %v351_v45 = vsel %vm348_vm6, %v347_v40, %v343_v43  ;;  %v350_v46 = vsel %vm348_vm6, %v343_v43, %v345_v35 }
 0x270   : > { %1532 = vmatpush3.msra.mxu1 %v351_v45 }
 0x271   : > { %362 = vmatpush1.msra.mxu0 %v350_v46  ;;  %1534 = vmatmul.mubr.msk.f32.vlgmr.msra.gmra.mrb[0].mxu1 %vm2119_vm0, %v352_v44 }
 0x272   : > { %1592 = vmatprep.subr.bf16.mxu1 %v1671_v9  ;;  %1485 = vmatmul.mubr.msk.f32.vlgmr.msra.gmra.mrb[0].mxu0 %vm2119_vm0, %v352_v44 }
 0x273   : > { %1589 = vmatprep.subr.bf16.mxu0 %v1581_v37  ;;  %1594 = vmatpush3.bf16.msra.mxu1 %v1586_v38 }
 0x274   : > { %1591 = vmatpush1.bf16.msra.mxu0 %v1583_v39  ;;  %1540 = vmatprep.subr.mxu1 %v1672_v18 }
 0x275   : > { %517 = vmatprep.subr.mxu0 %v349_v41  ;;  %577 = vmatprep.mubr.f32.mxu0 %v1672_v18 }
 0x276   : > { %1542 = vmatprep.mubr.msk.f32.mxu1 %vm2117_vm11, %v1672_v18 }
 0x277   : > { %1541 = vmatpush3.msra.mxu1 %v351_v45 }
 0x278   : > { %518 = vmatpush1.msra.mxu0 %v350_v46  ;;  %1599 = vmatprep.subr.bf16.mxu1 %v1671_v9 }
 0x279   : > { %1488 = vmatmul.mubr.msk.f32.vlgmr.msra.gmra.mrb[2].mxu0 %vm2119_vm0, %v1487_v48  ;;  %1543 = vmatmul.mubr.msk.f32.vlgmr.msra.gmra.mrb[2].mxu1 %vm2119_vm0, %v1487_v48 }
 0x27a   : > { %1596 = vmatprep.subr.bf16.mxu0 %v1581_v37  ;;  %1601 = vmatpush3.bf16.msra.mxu1 %v1586_v38  ;;  %v1962_v38 = vrot.slane %v198_v19, %v1741_v12 }
 0x27b   : > { %1598 = vmatpush1.bf16.msra.mxu0 %v1583_v39  ;;  %1549 = vmatprep.subr.mxu1 %v1672_v18 }
 0x27c   : > { %666 = vmatprep.subr.mxu0 %v349_v41  ;;  %726 = vmatprep.mubr.f32.mxu0 %v1672_v18 }
 0x27d   : > { %1551 = vmatprep.mubr.msk.f32.mxu1 %vm2117_vm11, %v1672_v18 }
 0x27e   : > { %1550 = vmatpush3.msra.mxu1 %v351_v45 }
 0x27f   : > { %667 = vmatpush1.msra.mxu0 %v350_v46  ;;  %1552 = vmatmul.mubr.msk.f32.vlgmr.msra.gmra.mrb[4].mxu1 %vm2119_vm0, %v1490_v49 }
 0x280   : > { %1491 = vmatmul.mubr.msk.f32.vlgmr.msra.gmra.mrb[4].mxu0 %vm2119_vm0, %v1490_v49  ;;  %1606 = vmatprep.subr.bf16.mxu1 %v1671_v9  ;;  %vm2120_vm0 = vcmp.lt.s32.totalorder %v1743_v13, 110 }
 0x281   : > { %1560 = vmatprep.mubr.msk.f32.mxu1 %vm2117_vm11, %v1672_v18  ;;  %993 = vmatprep.mubr.f32.mxu0 %v1672_v18  ;;  %vm504_vm11 = vcmp.lt.s32.totalorder %v1743_v13, 18 }
 0x344   : > { %v494_v50 = vpop.f32.mrb[0].mxu1 }
 0x345   : > { %502 = vrot.lane.b32.xlu1 %v494_v50, %s1676_s18  ;;  %v423_v51 = vpop.f32.mrb[0].mxu0  ;;  %v1535_v52 = vpop.f32.mrb[1].mxu1 }
 0x346   : > { %v425_v53 = vpop.f32.mrb[1].mxu0 }
 0x347   : > { %500 = vrot.lane.b32.xlu0 %v425_v53, %s1676_s18 }
 0x349   : > { %498 = vrot.lane.b32.xlu1 %v423_v51, %s1676_s18 }
 0x34c   : > { %v579_v56 = vpop.f32.mrb[2].mxu0  ;;  %v650_v57 = vpop.f32.mrb[2].mxu1 }
 0x34d   : > { %v581_v58 = vpop.f32.mrb[3].mxu0  ;;  %v1544_v59 = vpop.f32.mrb[3].mxu1 }
 0x352   : > { %v799_v60 = vpop.f32.mrb[4].mxu1 }
 0x353   : > { %v728_v61 = vpop.f32.mrb[4].mxu0  ;;  %v1553_v62 = vpop.f32.mrb[5].mxu1 }
 0x354   : > { %803 = vrot.lane.b32.xlu0 %v728_v61, %s1677_s19  ;;  %v730_v63 = vpop.f32.mrb[5].mxu0 }
 0x355   : > { %805 = vrot.lane.b32.xlu1 %v730_v63, %s1677_s19 }
 0x358   : > { %807 = vrot.lane.b32.xlu0 %v799_v60, %s1677_s19 }
 0x3b7   : > { %v503_v3 = vpop.permute.xlu1 %502 }
 0x3b9   : > { %v501_v4 = vpop.permute.xlu0 %500 }
 0x3ba   : > { %v505_v20 = vsel %vm504_vm11, %v501_v4, %v503_v3 }
 0x3bb   : > { %v499_v5 = vpop.permute.xlu1 %498  ;;  %v656_v27 = vadd.f32 %v650_v57, %v505_v20 }
 0x3bc   : > { %v507_v14 = vsel %vm504_vm11, %v503_v3, %v499_v5  ;;  %v506_v21 = vsel %vm504_vm11, %v499_v5, %v501_v4 }
 0x3bd   : > { %v654_v23 = vadd.f32 %v579_v56, %v507_v14  ;;  %v655_v28 = vadd.f32 %v581_v58, %v506_v21 }
 0x3c6   : > { %v804_v17 = vpop.permute.xlu0 %803 }
 0x3c7   : > { %v806_v22 = vpop.permute.xlu1 %805 }
 0x3c8   : > { %v811_v24 = vsel %vm2120_vm0, %v804_v17, %v806_v22 }
 0x3c9   : > { %v813_v29 = vadd.f32 %v811_v24, %v654_v23 }
 0x3ca   : > { %v808_v32 = vpop.permute.xlu0 %807 }
 0x3cb   : > { %v810_v33 = vsel %vm2120_vm0, %v806_v22, %v808_v32  ;;  %v812_v34 = vsel %vm2120_vm0, %v808_v32, %v804_v17  ;;  %v832_v6 = vmul.f32 %v1952_v26, %v813_v29 }
 0x3cc   : > { %v814_v35 = vadd.f32 %v810_v33, %v655_v28  ;;  %v815_v37 = vadd.f32 %v812_v34, %v656_v27 }
 0x3ce   : > { %v833_v39 = vmul.f32 %v1955_v31, %v814_v35  ;;  %v834_v40 = vmul.f32 %v1962_v38, %v815_v37 }
 0x3d0   : > { %v835_v7 = vadd.f32 %v833_v39, %v832_v6 }
 0x3d2   : > { %v836_v41 = vadd.f32 %v835_v7, %v834_v40 }
 0x3d4   : > { %837 = vadd.xlane.f32.xlu1 %v836_v41 }
 0x461   : > { %v838_v43 = vpop.xlane.xlu1 %837 }
 0x462   : > { %v839_v44 = vmul.f32 0.00390625, %v838_v43 }
 0x464   : > { %v840_v45 = vsub.f32 %v813_v29, %v839_v44  ;;  %v841_v46 = vsub.f32 %v814_v35, %v839_v44  ;;  %v842_v48 = vsub.f32 %v815_v37, %v839_v44 }
 0x466   : > { %v843_v49 = vmul.f32 %v840_v45, %v1952_v26  ;;  %v844_v50 = vmul.f32 %v841_v46, %v1955_v31  ;;  %v845_v12 = vmul.f32 %v842_v48, %v1962_v38 }
 0x468   : > { %v846_v51 = vmul.f32 %v843_v49, %v843_v49  ;;  %v847_v52 = vmul.f32 %v844_v50, %v844_v50  ;;  %v848_v53 = vmul.f32 %v845_v12, %v845_v12 }
 0x46a   : > { %v849_v56 = vadd.f32 %v847_v52, %v846_v51 }
 0x46c   : > { %v850_v57 = vadd.f32 %v849_v56, %v848_v53 }
 0x46e   : > { %851 = vadd.xlane.f32.xlu0 %v850_v57 }
 0x4fb   : > { %v852_v58 = vpop.xlane.xlu0 %851 }
 0x4fc   : > { %v853_v59 = vmul.f32 0.00390625, %v852_v58 }
 0x4fe   : > { %v854_v60 = vadd.f32 1e-05, %v853_v59 }
 0x500   : > { %1654 = vrsqrt.f32 %v854_v60 }
 0x50a   : > { %v1655_v61 = vpop.eup %1654 }
 0x50b   : > { %v857_v62 = vmul.f32 %v1655_v61, %v844_v50  ;;  %v856_v63 = vmul.f32 %v1655_v61, %v843_v49  ;;  %v858_v3 = vmul.f32 %v1655_v61, %v845_v12  ;;  %v925_v61 = vld [vmem:[%s2111_s3] sm:$0xff] }
 0x50d   : > { %861 = vrot.lane.b32.xlu1 %v857_v62, %s1666_s21  ;;  %859 = vrot.lane.b32.xlu0 %v856_v63, %s1666_s21 }
 0x511   : > { %863 = vrot.lane.b32.xlu1 %v858_v3, %s1666_s21 }
 0x57f   : > { %v862_v4 = vpop.permute.xlu1 %861  ;;  %v860_v5 = vpop.permute.xlu0 %859 }
 0x580   : > { %v866_v14 = vsel %vm222_vm3, %v860_v5, %v862_v4 }
 0x581   : > { %v868_v17 = vsel %vm1745_vm1, %v866_v14, %v856_v63  ;;  %vm2145_vm1 = vcmp.lt.s32.totalorder %v1743_v13, 2 }
 0x582   : > { %871 = vrot.lane.b32.xlu0 %v868_v17, %s1668_s24  ;;  %vm2146_vm0 = vmmov %vm2145_vm1 }
 0x583   : > { %v864_v19 = vpop.permute.xlu1 %863 }
 0x584   : > { %v865_v20 = vsel %vm222_vm3, %v862_v4, %v864_v19  ;;  %v867_v21 = vsel %vm222_vm3, %v864_v19, %v860_v5  ;;  %vm2148_vm3 = vcmp.lt.s32.totalorder %v1743_v13, 92  ;;  %v1498_v4 = vld [vmem:[%s2111_s3 + $0x10] sm:$0xff] }
 0x585   : > { %v869_v22 = vsel %vm1749_vm2, %v865_v20, %v857_v62  ;;  %v870_v23 = vsel %vm1769_vm4, %v867_v21, %v858_v3  ;;  %vm2147_vm2 = vmmov %vm2146_vm0  ;;  %v1495_v3 = vld [vmem:[%s2111_s3 + $0x8] sm:$0xff] }
 0x586   : > { %873 = vrot.lane.b32.xlu1 %v869_v22, %s1668_s24  ;;  %875 = vrot.lane.b32.xlu0 %v870_v23, %s1668_s24  ;;  %vm2149_vm4 = vmmov %vm2148_vm3 }
 0x5f4   : > { %v872_v15 = vpop.permute.xlu0 %871 }
 0x5f8   : > { %v874_v24 = vpop.permute.xlu1 %873  ;;  %v876_v27 = vpop.permute.xlu0 %875 }
 0x5f9   : > { %v878_v28 = vsel %vm2145_vm1, %v872_v15, %v874_v24  ;;  %v879_v29 = vsel %vm2146_vm0, %v876_v27, %v872_v15  ;;  %v877_v32 = vsel %vm2147_vm2, %v874_v24, %v876_v27 }
 0x5fa   : > { %v881_v16 = vsel %vm1783_vm7, %v878_v28, %v869_v22  ;;  %v880_v25 = vsel %vm1793_vm8, %v879_v29, %v868_v17  ;;  %v882_v33 = vsel %vm1805_vm9, %v877_v32, %v870_v23  ;;  %vm2150_vm7 = vmmov %vm2148_vm3  ;;  %vm2151_vm8 = vcmp.lt.s32.totalorder %v1743_v13, 36 }
 0x5fb   : > { %885 = vrot.lane.b32.xlu0 %v881_v16, %s1669_s27  ;;  %883 = vrot.lane.b32.xlu1 %v880_v25, %s1669_s27  ;;  %vm2152_vm9 = vmmov %vm2151_vm8 }
 0x5ff   : > { %887 = vrot.lane.b32.xlu1 %v882_v33, %s1669_s27 }
 0x66d   : > { %v884_v34 = vpop.permute.xlu1 %883  ;;  %v886_v35 = vpop.permute.xlu0 %885 }
 0x66e   : > { %v890_v30 = vsel %vm2148_vm3, %v884_v34, %v886_v35 }
 0x66f   : > { %v892_v36 = vsel %vm1818_vm12, %v890_v30, %v880_v25  ;;  %vm2153_vm12 = vmmov %vm2151_vm8 }
 0x670   : > { %895 = vrot.lane.b32.xlu0 %v892_v36, %s1670_s30 }
 0x671   : > { %v888_v37 = vpop.permute.xlu1 %887 }
 0x672   : > { %v889_v6 = vsel %vm2149_vm4, %v886_v35, %v888_v37  ;;  %v891_v42 = vsel %vm2150_vm7, %v888_v37, %v884_v34  ;;  %vm2164_vm4 = vcmp.lt.s32.totalorder %v1743_v13, 110 }
 0x673   : > { %v894_v39 = vsel %vm1829_vm13, %v891_v42, %v882_v33  ;;  %v893_v40 = vsel %vm1833_vm14, %v889_v6, %v881_v16  ;;  %vm2154_vm13 = vcmp.lt.s32.totalorder %v1743_v13, 1  ;;  %vm2165_vm7 = vmmov %vm2164_vm4 }
 0x674   : > { %899 = vrot.lane.b32.xlu0 %v894_v39, %s1670_s30  ;;  %897 = vrot.lane.b32.xlu1 %v893_v40, %s1670_s30  ;;  %vm2155_vm14 = vmmov %vm2154_vm13  ;;  %s197_s30 = scalar_lea.vmem %s2112_s4, %s1623_s17 }
 0x675   : > { %vm2156_vm0 = vmmov %vm2154_vm13 }
 0x6e2   : > { %v896_v47 = vpop.permute.xlu0 %895 }
 0x6e6   : > { %v900_v7 = vpop.permute.xlu0 %899  ;;  %v898_v41 = vpop.permute.xlu1 %897 }
 0x6e7   : > { %v903_v43 = vsel %vm2151_vm8, %v900_v7, %v896_v47  ;;  %v901_v44 = vsel %vm2152_vm9, %v898_v41, %v900_v7  ;;  %v902_v54 = vsel %vm2153_vm12, %v896_v47, %v898_v41  ;;  %vm2166_vm8 = vmmov %vm2164_vm4 }
 0x6e8   : > { %v904_v55 = vsel %vm1856_vm5, %v903_v43, %v892_v36  ;;  %v905_v45 = vsel %vm1860_vm10, %v902_v54, %v893_v40  ;;  %v906_v46 = vsel %vm1864_vm15, %v901_v44, %v894_v39  ;;  %vm2157_vm5 = vcmask 195584  }
 0x6e9   : > { %911 = vrot.lane.b32.xlu0 %v906_v46, %s1674_s7  ;;  %v1649_v48 = vpack.i.bf16 %v905_v45, %v904_v55  ;;  %vm2158_vm10 = vmmov %vm2157_vm5  ;;  %vm2159_vm15 = vmmov 0  }
 0x6ea   : > { %vm2161_vm1 = vmmov %vm2157_vm5 }
 0x6eb   : > { %1650 = vrot.lane.b32.xlu1 %v1649_v48, %s1674_s7  ;;  %vm2162_vm2 = vmmov %vm2161_vm1 }
 0x6ec   : > { %vm2163_vm3 = vmmov %vm2161_vm1 }
 0x6ed   : > { %920 = vrot.lane.b32.xlu0 %v906_v46, %s1675_s8 }
 0x6ef   : > { %918 = vrot.lane.b32.xlu1 %v905_v45, %s1675_s8 }
 0x6f3   : > { %916 = vrot.lane.b32.xlu1 %v904_v55, %s1675_s8 }
 0x75b   : > { %v912_v49 = vpop.permute.xlu0 %911 }
 0x75d   : > { %v1651_v10 = vpop.permute.xlu1 %1650 }
 0x75e   : > { %v1653_v50 = vunpack.i.h.bf16 %v1651_v10  ;;  %v1652_v12 = vunpack.i.l.bf16 %v1651_v10 }
 0x75f   : > { %v921_v58 = vpop.permute.xlu0 %920 }
 0x760   : > { %v913_v11 = vsel %vm2154_vm13, %v1653_v50, %v912_v49  ;;  %v915_v8 = vsel %vm2155_vm14, %v912_v49, %v1652_v12  ;;  %v914_v51 = vsel %vm2156_vm0, %v1652_v12, %v1653_v50 }
 0x761   : > { %v1604_v52 = vpack.c.bf16 %v904_v55, %v915_v8  ;;  %v1607_v53 = vpack.c.bf16 %v906_v46, %v913_v11  ;;  %v919_v56 = vpop.permute.xlu1 %918  ;;  %v1602_v57 = vpack.c.bf16 %v905_v45, %v914_v51 }
 0x762   : > { %v922_v59 = vsel %vm348_vm6, %v919_v56, %v921_v58 }
 0x763   : > { %1603 = vmatprep.subr.bf16.mxu0 %v1602_v57  ;;  %1608 = vmatpush3.bf16.msra.mxu1 %v1607_v53 }
 0x764   : > { %1605 = vmatpush1.bf16.msra.mxu0 %v1604_v52  ;;  %1558 = vmatprep.subr.mxu1 %v1672_v18 }
 0x765   : > { %v917_v60 = vpop.permute.xlu1 %916  ;;  %933 = vmatprep.subr.mxu0 %v922_v59 }
 0x766   : > { %v923_v62 = vsel %vm348_vm6, %v917_v60, %v919_v56  ;;  %v924_v63 = vsel %vm348_vm6, %v921_v58, %v917_v60  ;;  %vm2160_vm6 = vmmov %vm2157_vm5 }
 0x767   : > { %1559 = vmatpush3.msra.mxu1 %v924_v63 }
 0x768   : > { %934 = vmatpush1.msra.mxu0 %v923_v62  ;;  %1561 = vmatmul.mubr.msk.f32.vlgmr.msra.gmra.mrb[6].mxu1 %vm2157_vm5, %v925_v61 }
 0x769   : > { %1613 = vmatprep.subr.bf16.mxu1 %v1671_v9  ;;  %1493 = vmatmul.mubr.msk.f32.vlgmr.msra.gmra.mrb[6].mxu0 %vm2158_vm10, %v925_v61 }
 0x76a   : > { %1610 = vmatprep.subr.bf16.mxu0 %v1602_v57  ;;  %1615 = vmatpush3.bf16.msra.mxu1 %v1607_v53 }
 0x76b   : > { %1612 = vmatpush1.bf16.msra.mxu0 %v1604_v52  ;;  %1567 = vmatprep.subr.mxu1 %v1672_v18 }
 0x76c   : > { %1088 = vmatprep.subr.mxu0 %v922_v59  ;;  %1148 = vmatprep.mubr.f32.mxu0 %v1672_v18 }
 0x76d   : > { %1569 = vmatprep.mubr.msk.f32.mxu1 %vm2159_vm15, %v1672_v18 }
 0x76e   : > { %1568 = vmatpush3.msra.mxu1 %v924_v63 }
 0x76f   : > { %1089 = vmatpush1.msra.mxu0 %v923_v62  ;;  %1620 = vmatprep.subr.bf16.mxu1 %v1671_v9 }
 0x770   : > { %1496 = vmatmul.mubr.msk.f32.vlgmr.msra.gmra.mrb[8].mxu0 %vm2160_vm6, %v1495_v3  ;;  %1570 = vmatmul.mubr.msk.f32.vlgmr.msra.gmra.mrb[8].mxu1 %vm2161_vm1, %v1495_v3 }
 0x771   : > { %1617 = vmatprep.subr.bf16.mxu0 %v1602_v57  ;;  %1622 = vmatpush3.bf16.msra.mxu1 %v1607_v53 }
 0x772   : > { %1619 = vmatpush1.bf16.msra.mxu0 %v1604_v52  ;;  %1576 = vmatprep.subr.mxu1 %v1672_v18 }
 0x773   : > { %1237 = vmatprep.subr.mxu0 %v922_v59  ;;  %1297 = vmatprep.mubr.f32.mxu0 %v1672_v18 }
 0x774   : > { %1578 = vmatprep.mubr.msk.f32.mxu1 %vm2159_vm15, %v1672_v18 }
 0x775   : > { %1577 = vmatpush3.msra.mxu1 %v924_v63 }
 0x776   : > { %1238 = vmatpush1.msra.mxu0 %v923_v62  ;;  %1579 = vmatmul.mubr.msk.f32.vlgmr.msra.gmra.mrb[10].mxu1 %vm2162_vm2, %v1498_v4 }
 0x777   : > { %1499 = vmatmul.mubr.msk.f32.vlgmr.msra.gmra.mrb[10].mxu0 %vm2163_vm3, %v1498_v4 }
 0x83b   : > { %v1066_v9 = vpop.f32.mrb[6].mxu1 }
 0x83c   : > { %1074 = vrot.lane.b32.xlu0 %v1066_v9, %s1676_s18  ;;  %v995_v5 = vpop.f32.mrb[6].mxu0  ;;  %v1562_v14 = vpop.f32.mrb[7].mxu1 }
 0x83d   : > { %v997_v17 = vpop.f32.mrb[7].mxu0 }
 0x83e   : > { %1072 = vrot.lane.b32.xlu1 %v997_v17, %s1676_s18 }
 0x840   : > { %1070 = vrot.lane.b32.xlu0 %v995_v5, %s1676_s18 }
 0x843   : > { %v1150_v19 = vpop.f32.mrb[8].mxu0  ;;  %v1221_v20 = vpop.f32.mrb[8].mxu1 }
 0x844   : > { %v1152_v21 = vpop.f32.mrb[9].mxu0  ;;  %v1571_v18 = vpop.f32.mrb[9].mxu1 }
 0x849   : > { %v1370_v22 = vpop.f32.mrb[10].mxu1 }
 0x84a   : > { %v1299_v23 = vpop.f32.mrb[10].mxu0  ;;  %v1580_v15 = vpop.f32.mrb[11].mxu1 }
 0x84b   : > { %1374 = vrot.lane.b32.xlu1 %v1299_v23, %s1677_s19  ;;  %v1301_v24 = vpop.f32.mrb[11].mxu0 }
 0x84c   : > { %1376 = vrot.lane.b32.xlu0 %v1301_v24, %s1677_s19 }
 0x84f   : > { %1378 = vrot.lane.b32.xlu1 %v1370_v22, %s1677_s19 }
 0x8ae   : > { %v1075_v27 = vpop.permute.xlu0 %1074 }
 0x8b0   : > { %v1073_v28 = vpop.permute.xlu1 %1072 }
 0x8b1   : > { %v1076_v32 = vsel %vm504_vm11, %v1073_v28, %v1075_v27 }
 0x8b2   : > { %v1071_v29 = vpop.permute.xlu0 %1070  ;;  %v1227_v36 = vadd.f32 %v1221_v20, %v1076_v32 }
 0x8b3   : > { %v1078_v16 = vsel %vm504_vm11, %v1075_v27, %v1071_v29  ;;  %v1077_v33 = vsel %vm504_vm11, %v1071_v29, %v1073_v28 }
 0x8b4   : > { %v1225_v35 = vadd.f32 %v1150_v19, %v1078_v16  ;;  %v1226_v37 = vadd.f32 %v1152_v21, %v1077_v33 }
 0x8bd   : > { %v1375_v25 = vpop.permute.xlu1 %1374 }
 0x8be   : > { %v1377_v34 = vpop.permute.xlu0 %1376 }
 0x8bf   : > { %v1381_v30 = vsel %vm2164_vm4, %v1375_v25, %v1377_v34 }
 0x8c0   : > { %v1383_v6 = vadd.f32 %v1381_v30, %v1225_v35 }
 0x8c1   : > { %v1379_v42 = vpop.permute.xlu1 %1378 }
 0x8c2   : > { %v1380_v39 = vsel %vm2165_vm7, %v1377_v34, %v1379_v42  ;;  %v1382_v40 = vsel %vm2166_vm8, %v1379_v42, %v1375_v25  ;;  %v1386_v41 = vmul.f32 %v1383_v6, %v1952_v26 }
 0x8c3   : > { %v1384_v47 = vadd.f32 %v1380_v39, %v1226_v37  ;;  %v1385_v7 = vadd.f32 %v1382_v40, %v1227_v36 }
 0x8c5   : > { %v1387_v43 = vmul.f32 %v1384_v47, %v1955_v31  ;;  %v1388_v44 = vmul.f32 %v1385_v7, %v1962_v38 }
 0x8c7   : > { %v1389_v54 = vadd.f32 %v1387_v43, %v1386_v41 }
 0x8c9   : > { %v1390_v55 = vadd.f32 %v1389_v54, %v1388_v44 }
 0x8cb   : > { %1391 = vadd.xlane.f32.xlu0 %v1390_v55 }
 0x958   : > { %v1392_v45 = vpop.xlane.xlu0 %1391 }
 0x959   : > { %v1393_v46 = vmul.f32 0.00390625, %v1392_v45 }
 0x95b   : > { %v1394_v48 = vsub.f32 %v1383_v6, %v1393_v46  ;;  %v1395_v49 = vsub.f32 %v1384_v47, %v1393_v46  ;;  %v1396_v10 = vsub.f32 %v1385_v7, %v1393_v46 }
 0x95d   : > { %v1397_v50 = vmul.f32 %v1394_v48, %v1952_v26  ;;  %v1398_v13 = vmul.f32 %v1395_v49, %v1955_v31  ;;  %v1399_v12 = vmul.f32 %v1396_v10, %v1962_v38 }
 0x95f   : > { %v1400_v11 = vmul.f32 %v1397_v50, %v1397_v50  ;;  %v1401_v8 = vmul.f32 %v1398_v13, %v1398_v13  ;;  %v1402_v51 = vmul.f32 %v1399_v12, %v1399_v12 }
 0x961   : > { %v1403_v52 = vadd.f32 %v1401_v8, %v1400_v11 }
 0x963   : > { %v1404_v53 = vadd.f32 %v1403_v52, %v1402_v51 }
 0x965   : > { %1405 = vadd.xlane.f32.xlu1 %v1404_v53 }
 0x9f2   : > { %v1406_v56 = vpop.xlane.xlu1 %1405 }
 0x9f3   : > { %v1407_v57 = vmul.f32 0.00390625, %v1406_v56 }
 0x9f5   : > { %v1408_v58 = vadd.f32 1e-05, %v1407_v57 }
 0x9f7   : > { %1656 = vrsqrt.f32 %v1408_v58 }
 0xa01   : > { %v1657_v59 = vpop.eup %1656 }
 0xa02   : > { %v1410_v60 = vmul.f32 %v1657_v59, %v1397_v50  ;;  %v1411_v61 = vmul.f32 %v1657_v59, %v1398_v13  ;;  %v1412_v62 = vmul.f32 %v1657_v59, %v1399_v12 }
 0xa04   : > { %v1413_v26 = vadd.f32 %v1410_v60, %v1721_v1  ;;  %v1414_v31 = vadd.f32 %v1411_v61, %v1727_v2  ;;  %v1415_v38 = vadd.f32 %v1412_v62, %v1719_v0 }
 0xa06   : > { %1416 = vst [vmem:[%s197_s30] sm:$0xff] %v1413_v26  ;;  %1417 = vst [vmem:[%s197_s30 + $0x8] sm:$0xff] %v1414_v31 }
 0xa07   : > { %1418 = vst [vmem:[%s197_s30 + $0x10] sm:$0xff] %v1415_v38 }
 0xa08 PF: > { %s14_s15 = sadd.s32 1, %s1664_s15  }
 0xa09   : > { %p11_p4 = scmp.ge.s32.totalorder %s14_s15, 4  }
 0xa0b   :  { %13 = sbr.rel (!%p11_p4) target bundleno = 1 (0x1), region = 74 }

</bundles_post_ra>
